<compile_context>
chip_gen: v7x
topology: tpu7x:2x2x1
jax: 0.10.0
libtpu: 0.0.40
codegen_flags: <defaults>
</compile_context>

<pallas_src>
import types

import jax
import jax.numpy as jnp
from jax import lax
from jax.experimental import pallas as pl
from jax.experimental.pallas import tpu as pltpu


def _closest_pool_kernel(idx_ref, x_hbm, o_ref, slab, sem):
    # idx_ref: SMEM [n2_pad] int32   (scalar prefetch; first-neighbor index per out row)
    # x_hbm:   HBM  [n1 + 1, d]      (padded feature table; row n1 is the shadow zero row)
    # o_ref:   VMEM [row_block, d]   (output tile)
    # slab:    VMEM [row_block, d]   (DMA-gather destination)
    # sem:     DMA semaphore array of shape (1,), shared by all row copies of this step
    rows = o_ref.shape[0]
    base = pl.program_id(0) * rows

    def row_copy(r):
        src = idx_ref[base + r]
        return pltpu.make_async_copy(
            x_hbm.at[pl.ds(src, 1), :],   # one scattered row of the padded table
            slab.at[pl.ds(r, 1), :],      # its slot in the gathered block
            sem.at[0],
        )

    # issue all row gathers for this output block (DMAs overlap each other)
    def _start(r, carry):
        row_copy(r).start()
        return carry

    lax.fori_loop(0, rows, _start, 0)

    # wait for all of them (same-sized copies share one semaphore)
    def _wait(r, carry):
        row_copy(r).wait()
        return carry

    lax.fori_loop(0, rows, _wait, 0)

    # single full-tile, lane-dense store of the gathered block
    o_ref[...] = slab[...]


def closest_pool_pallas(x, inds, *, row_block=128):
    """Pools features from the closest (first-listed) neighbor — Pallas TPU kernel.

    x:    [n1, d] float features
    inds: [n2, max_num] int32 indices in [0, n1] (n1 selects the shadow zero row);
          only column 0 is used (closest_pool assumes ordered neighbors).
    returns [n2, d]
    """
    assert row_block % 8 == 0, "row_block must be a multiple of 8 (sublane tiling)"
    n1, d = x.shape
    idx0 = (inds[:, 0] if inds.ndim == 2 else inds).astype(jnp.int32)
    n2 = idx0.shape[0]

    # torch: x = torch.cat((x, torch.zeros_like(x[:1, :])), 0)
    x_pad = jnp.concatenate([x, jnp.zeros((1, d), x.dtype)], axis=0)

    # pad output-row count to a multiple of row_block; padded rows gather the shadow
    # zero row and are sliced off afterwards (handles ragged n2).
    n2_pad = ((n2 + row_block - 1) // row_block) * row_block
    if n2_pad != n2:
        idx0 = jnp.concatenate(
            [idx0, jnp.full((n2_pad - n2,), n1, dtype=jnp.int32)], axis=0)

    grid = (n2_pad // row_block,)
    out = pl.pallas_call(
        _closest_pool_kernel,
        out_shape=jax.ShapeDtypeStruct((n2_pad, d), x.dtype),
        grid_spec=pltpu.PrefetchScalarGridSpec(
            num_scalar_prefetch=1,
            grid=grid,
            in_specs=[
                # feature table stays in HBM; rows are DMA-gathered on demand
                pl.BlockSpec(memory_space=pl.ANY),
            ],
            out_specs=pl.BlockSpec((row_block, d), lambda i, idx_ref: (i, 0)),
            scratch_shapes=[
                pltpu.VMEM((row_block, d), x.dtype),
                pltpu.SemaphoreType.DMA((1,)),
            ],
        ),
        compiler_params=pltpu.CompilerParams(
            dimension_semantics=("parallel",),
            vmem_limit_bytes=32 * 1024 * 1024,
        ),
    )(idx0, x_pad)
    return out[:n2]


class NearestUpsampleBlock:
    """JAX/Pallas equivalent of ml3d NearestUpsampleBlock (no learnable params)."""

    def __init__(self, layer_ind):
        self.layer_ind = layer_ind

    def __call__(self, x, batch):
        return closest_pool_pallas(x, batch.upsamples[self.layer_ind - 1])

    def __repr__(self):
        return 'NearestUpsampleBlock(layer: {:d} -> {:d})'.format(
            self.layer_ind, self.layer_ind - 1)


if __name__ == "__main__":
    key = jax.random.PRNGKey(0)
    k_x, k_idx = jax.random.split(key)

    n1, d = 24, 128        # coarse-level points, feature dim (lane-aligned)
    n2, max_num = 56, 3    # fine-level points, neighbors per point (ragged vs row_block)
    layer_ind = 1

    x = jax.random.normal(k_x, (n1, d), dtype=jnp.float32)
    # indices in [0, n1] inclusive; value n1 hits the shadow zero row
    upsample_inds = jax.random.randint(
        k_idx, (n2, max_num), 0, n1 + 1, dtype=jnp.int32)

    batch = types.SimpleNamespace(upsamples=[upsample_inds])

    block = NearestUpsampleBlock(layer_ind)
    out = jax.block_until_ready(block(x, batch))

    # reference (pure JAX) check of closest_pool semantics
    x_pad = jnp.concatenate([x, jnp.zeros((1, d), x.dtype)], axis=0)
    ref = x_pad[upsample_inds[:, 0]]
    assert out.shape == (n2, d)
    assert jnp.allclose(out, ref), "mismatch vs reference"

    print("KERNEL_OK")
</pallas_src>

<mosaic_0001>
module attributes {stable_mosaic.version = 11 : i64} {
  func.func @_closest_pool_kernel(%arg0: i32, %arg1: memref<128xi32, #tpu.memory_space<smem>>, %arg2: memref<25x128xf32, #tpu.memory_space<any>>, %arg3: memref<128x128xf32, #tpu.memory_space<vmem>>, %arg4: memref<128x128xf32, #tpu.memory_space<vmem>>, %arg5: memref<1x!tpu.dma_semaphore, #tpu.memory_space<semaphore_mem>>) attributes {dimension_semantics = [#tpu.dimension_semantics<parallel>], iteration_bounds = array<i64: 1>, scalar_prefetch = 1 : i64, scratch_operands = 2 : i64, tpu.core_type = #tpu.core_type<tc>, window_params = [{}, {transform_indices = @transform_1, window_bounds = array<i64: 128, 128>}]} {
    %c128_i32 = arith.constant 128 : i32
    %0 = arith.muli %arg0, %c128_i32 : i32
    %c0_i32 = arith.constant 0 : i32
    %c128_i32_0 = arith.constant 128 : i32
    %1 = arith.addi %c0_i32, %c128_i32_0 : i32
    %c1_i32 = arith.constant 1 : i32
    scf.for %arg6 = %c0_i32 to %1 step %c1_i32  : i32 {
      %5 = arith.addi %0, %arg6 : i32
      %6 = arith.index_cast %5 : i32 to index
      %7 = memref.load %arg1[%6] : memref<128xi32, #tpu.memory_space<smem>>
      %c0_i32_9 = arith.constant 0 : i32
      %c0_i32_10 = arith.constant 0 : i32
      %8 = tpu.memref_slice %arg2[%7, %c0_i32_10] : memref<25x128xf32, #tpu.memory_space<any>> -> memref<1x128xf32, #tpu.memory_space<any>>
      %c0_i32_11 = arith.constant 0 : i32
      %9 = tpu.memref_slice %arg4[%arg6, %c0_i32_11] : memref<128x128xf32, #tpu.memory_space<vmem>> -> memref<1x128xf32, #tpu.memory_space<vmem>>
      %10 = tpu.memref_slice %arg5[%c0_i32_9] : memref<1x!tpu.dma_semaphore, #tpu.memory_space<semaphore_mem>> -> memref<1x!tpu.dma_semaphore, #tpu.memory_space<semaphore_mem>>
      %11 = tpu.memref_squeeze %10 : memref<1x!tpu.dma_semaphore, #tpu.memory_space<semaphore_mem>> -> memref<!tpu.dma_semaphore, #tpu.memory_space<semaphore_mem>>
      tpu.enqueue_dma source(%8 : memref<1x128xf32, #tpu.memory_space<any>>) target(%9 : memref<1x128xf32, #tpu.memory_space<vmem>>) target_semaphore(%11 : memref<!tpu.dma_semaphore, #tpu.memory_space<semaphore_mem>>)
    }
    %c128_i32_1 = arith.constant 128 : i32
    %c0_i32_2 = arith.constant 0 : i32
    %c128_i32_3 = arith.constant 128 : i32
    %2 = arith.addi %c0_i32_2, %c128_i32_3 : i32
    %c1_i32_4 = arith.constant 1 : i32
    scf.for %arg6 = %c0_i32_2 to %2 step %c1_i32_4  : i32 {
      %5 = arith.addi %0, %arg6 : i32
      %6 = arith.index_cast %5 : i32 to index
      %7 = memref.load %arg1[%6] : memref<128xi32, #tpu.memory_space<smem>>
      %c0_i32_9 = arith.constant 0 : i32
      %c0_i32_10 = arith.constant 0 : i32
      %8 = tpu.memref_slice %arg2[%7, %c0_i32_10] : memref<25x128xf32, #tpu.memory_space<any>> -> memref<1x128xf32, #tpu.memory_space<any>>
      %c0_i32_11 = arith.constant 0 : i32
      %9 = tpu.memref_slice %arg4[%arg6, %c0_i32_11] : memref<128x128xf32, #tpu.memory_space<vmem>> -> memref<1x128xf32, #tpu.memory_space<vmem>>
      %10 = tpu.memref_slice %arg5[%c0_i32_9] : memref<1x!tpu.dma_semaphore, #tpu.memory_space<semaphore_mem>> -> memref<1x!tpu.dma_semaphore, #tpu.memory_space<semaphore_mem>>
      %11 = tpu.memref_squeeze %10 : memref<1x!tpu.dma_semaphore, #tpu.memory_space<semaphore_mem>> -> memref<!tpu.dma_semaphore, #tpu.memory_space<semaphore_mem>>
      tpu.wait_dma2 semaphore(%11 : memref<!tpu.dma_semaphore, #tpu.memory_space<semaphore_mem>>) src(%8 : memref<1x128xf32, #tpu.memory_space<any>>) dst(%9 : memref<1x128xf32, #tpu.memory_space<vmem>>)
    }
    %c128_i32_5 = arith.constant 128 : i32
    %c0 = arith.constant 0 : index
    %c0_6 = arith.constant 0 : index
    %3 = vector.load %arg4[%c0, %c0_6] : memref<128x128xf32, #tpu.memory_space<vmem>>, vector<128x128xf32>
    %c0_7 = arith.constant 0 : index
    %c0_8 = arith.constant 0 : index
    %4 = vector.load %arg3[%c0_7, %c0_8] : memref<128x128xf32, #tpu.memory_space<vmem>>, vector<128x128xf32>
    tpu.vector_store %arg3[%c0_7, %c0_8], %3 {strides = array<i32>} : memref<128x128xf32, #tpu.memory_space<vmem>>, vector<128x128xf32>,
    return
  }
  func.func @transform_1(%arg0: i32, %arg1: memref<128xi32, #tpu.memory_space<smem>>) -> (i32, i32) {
    %c0_i32 = arith.constant 0 : i32
    %c0_i32_0 = arith.constant 0 : i32
    return %arg0, %c0_i32 : i32, i32
  }
}

</mosaic_0001>

<bundles_post_ra>
// kernel: tpu_custom_call.1
= control target key start
LH: loop header
LB: loop body
LE: loop exit
PB: predicated region body
PF: predicated region fallthrough
CT: control target
= control target key end

     0   :  { %s276_s0 = inlined_call_operand.hbm [shape: s32[128], index: 0, kind: input, shape index: {}]   ;;  %s277_s1 = inlined_call_operand.hbm [shape: f32[25,128], index: 1, kind: input, shape index: {}]   ;;  %s278_s2 = inlined_call_operand.hbm [shape: f32[128,128], index: 2, kind: output, shape index: {}]  }
   0x1   :  { %s135_s11 = scalar_lea.hbm %s276_s0, 16 }
   0x2   :  { %p136_p0 = scmp.ne.s32.totalorder %s276_s0, %s135_s11  ;;  %p139_p1 = scmp.lt.u32.totalorder %s135_s11, %s276_s0 }
   0x4   :  { %p141_p2 = pnand %p139_p1, %p136_p0 }
   0x6   :  { %144 = shalt.err (!%p141_p2)  }
   0x7   :  { %s213_s16 = smov [#allocation5]  }
   0x8   :  { %8 = dma.hbm_to_smem %s276_s0, 16, %s213_s16, [#allocation4] }
   0x9   :  { %199 = dma.done.wait [#allocation4], 16 }
   0xa   :  { %200 = vsyncadd [#allocation4], 4294967280 }
   0xb   :  { %10 = sfence }
   0xc   :  { %11 = vsyncpa [#allocation7], 0  ;;  %s245_s19 = smov 0  }
   0xd LB: > { %s20_s20 = sld [smem:[#allocation5 + %s207_s19]]  ;;  %s23_s21 = scalar_lea.vmem [#allocation2], %s207_s19  ;;  %s207_s19 = sphi %s245_s19, %s18_s19  }
   0xe   : > { %s31_s22 = sshll.u32 %s23_s21, 4  ;;  %s147_s29 = scalar_lea.hbm %s277_s1, 512  ;;  %s32_s22 = int_to_ptr.vmem [resolvable:$true] %s31_s22 }
  0x13   : > { %s113_s23 = sshll.u32 %s20_s20, 4 }
  0x14   : > { %s22_s25 = scalar_lea.hbm %s277_s1, %s113_s23 }
  0x15   : > { %s145_s26 = scalar_lea.hbm %s22_s25, 16  ;;  %p148_p4 = scmp.lt.u32.totalorder %s22_s25, %s277_s1 }
  0x16   : > { %p146_p3 = scmp.ne.s32.totalorder %s22_s25, %s145_s26  ;;  %p149_p5 = scmp.lt.u32.totalorder %s147_s29, %s145_s26 }
  0x17   : > { %p151_p7 = scmp.lt.u32.totalorder %s145_s26, %s22_s25 }
  0x18   : > { %p150_p6 = por %p149_p5, %p148_p4 }
  0x1a   : > { %p152_p8 = por %p151_p7, %p150_p6 }
  0x1c   : > { %p153_p9 = pnand %p152_p8, %p146_p3 }
  0x1e   : > { %156 = shalt.err (!%p153_p9)  }
  0x1f   : > { %s157_s4 = scalar_lea.vmem %s32_s22, 16  ;;  %s214_s5 = smov [#allocation2]  }
  0x20   : > { %p158_p10 = scmp.ne.s32.totalorder %s32_s22, %s157_s4  ;;  %s159_s6 = sshll.u32 %s214_s5, 4  ;;  %s160_s6 = int_to_ptr.vmem [resolvable:$false] %s159_s6 }
  0x21   : > { %s161_s7 = scalar_lea.vmem %s160_s6, 2048  ;;  %p162_p11 = scmp.lt.s32.totalorder %s32_s22, %s160_s6 }
  0x22   : > { %p163_p12 = scmp.lt.s32.totalorder %s161_s7, %s157_s4 }
  0x24   : > { %p164_p13 = por %p163_p12, %p162_p11 }
  0x26   : > { %p165_p0 = pnand %p164_p13, %p158_p10 }
  0x28   : > { %168 = shalt.err (!%p165_p0)  }
  0x29   : > { %34 = dma.hbm_to_vmem [thread:$0]  %s22_s25, 16, %s32_s22, [#allocation3] }
  0x2a   : > { %s18_s19 = sadd.s32 1, %s207_s19  }
  0x2b   : > { %p15_p1 = scmp.ge.s32.totalorder %s18_s19, 128  }
  0x2c   :  { %s209_s8 = smov (%p15_p1), 0  }
  0x2d   :  { %17 = sbr.rel (!%p15_p1) target bundleno = 13 (0xd), region = 40 }
  0x34 LB: > { %201 = dma.done.wait [#allocation3], 16  ;;  %s211_s8 = sphi %s209_s8, %s40_s8  }
  0x35   : > { %202 = vsyncadd [#allocation3], 4294967280  ;;  %s40_s8 = sadd.s32 1, %s211_s8  }
  0x36   : > { %p37_p2 = scmp.ge.s32.totalorder %s40_s8, 128  }
  0x37   :  { %v46_v0 = vld [vmem:[#allocation2] sm:$0xff] (%p37_p2)  ;;  %v47_v1 = vld [vmem:[#allocation2 + $0x8] sm:$0xff] (%p37_p2)  ;;  %v48_v2 = vld [vmem:[#allocation2 + $0x10] sm:$0xff] (%p37_p2)  ;;  %s215_s9 = smov (%p37_p2), [#allocation6]  }
  0x38   :  { %39 = sbr.rel (!%p37_p2) target bundleno = 52 (0x34), region = 51  ;;  %62 = vst [vmem:[#allocation6] sm:$0xff] (%p37_p2), %v46_v0  ;;  %63 = vst [vmem:[#allocation6 + $0x8] sm:$0xff] (%p37_p2), %v47_v1  ;;  %v49_v3 = vld [vmem:[#allocation2 + $0x18] sm:$0xff] (%p37_p2)  ;;  %v50_v4 = vld [vmem:[#allocation2 + $0x20] sm:$0xff] (%p37_p2)  ;;  %s83_s1 = sshll.u32 (%p37_p2), %s215_s9, 4  ;;  %s84_s1 = int_to_ptr.vmem [resolvable:$true] %s83_s1 }
  0x39   :  { %64 = vst [vmem:[#allocation6 + $0x10] sm:$0xff] (%p37_p2), %v48_v2  ;;  %v51_v5 = vld [vmem:[#allocation2 + $0x28] sm:$0xff] (%p37_p2)  ;;  %65 = vst [vmem:[#allocation6 + $0x18] sm:$0xff] (%p37_p2), %v49_v3  ;;  %v52_v6 = vld [vmem:[#allocation2 + $0x30] sm:$0xff] (%p37_p2)  ;;  %s169_s10 = scalar_lea.vmem (%p37_p2), %s84_s1, 2048  ;;  %p174_p4 = scmp.lt.s32.totalorder (%p37_p2), %s84_s1, %s84_s1 }
  0x3a   :  { %66 = vst [vmem:[#allocation6 + $0x20] sm:$0xff] (%p37_p2), %v50_v4  ;;  %67 = vst [vmem:[#allocation6 + $0x28] sm:$0xff] (%p37_p2), %v51_v5  ;;  %v53_v7 = vld [vmem:[#allocation2 + $0x38] sm:$0xff] (%p37_p2)  ;;  %v54_v8 = vld [vmem:[#allocation2 + $0x40] sm:$0xff] (%p37_p2)  ;;  %p170_p3 = scmp.ne.s32.totalorder (%p37_p2), %s84_s1, %s169_s10  ;;  %p175_p5 = scmp.lt.s32.totalorder (%p37_p2), %s169_s10, %s169_s10 }
  0x3b   :  { %68 = vst [vmem:[#allocation6 + $0x30] sm:$0xff] (%p37_p2), %v52_v6  ;;  %69 = vst [vmem:[#allocation6 + $0x38] sm:$0xff] (%p37_p2), %v53_v7  ;;  %v55_v9 = vld [vmem:[#allocation2 + $0x48] sm:$0xff] (%p37_p2)  ;;  %v56_v10 = vld [vmem:[#allocation2 + $0x50] sm:$0xff] (%p37_p2) }
  0x3c   :  { %70 = vst [vmem:[#allocation6 + $0x40] sm:$0xff] (%p37_p2), %v54_v8  ;;  %v57_v11 = vld [vmem:[#allocation2 + $0x58] sm:$0xff] (%p37_p2)  ;;  %71 = vst [vmem:[#allocation6 + $0x48] sm:$0xff] (%p37_p2), %v55_v9  ;;  %v58_v12 = vld [vmem:[#allocation2 + $0x60] sm:$0xff] (%p37_p2)  ;;  %p176_p6 = por (%p37_p2), %p175_p5, %p174_p4 }
  0x3d   :  { %72 = vst [vmem:[#allocation6 + $0x50] sm:$0xff] (%p37_p2), %v56_v10  ;;  %73 = vst [vmem:[#allocation6 + $0x58] sm:$0xff] (%p37_p2), %v57_v11  ;;  %v59_v13 = vld [vmem:[#allocation2 + $0x68] sm:$0xff] (%p37_p2)  ;;  %v60_v14 = vld [vmem:[#allocation2 + $0x70] sm:$0xff] (%p37_p2) }
  0x3e   :  { %74 = vst [vmem:[#allocation6 + $0x60] sm:$0xff] (%p37_p2), %v58_v12  ;;  %75 = vst [vmem:[#allocation6 + $0x68] sm:$0xff] (%p37_p2), %v59_v13  ;;  %v61_v15 = vld [vmem:[#allocation2 + $0x78] sm:$0xff] (%p37_p2)  ;;  %p177_p7 = pnand (%p37_p2), %p176_p6, %p170_p3 }
  0x3f   :  { %76 = vst [vmem:[#allocation6 + $0x70] sm:$0xff] %v60_v14  ;;  %77 = vst [vmem:[#allocation6 + $0x78] sm:$0xff] %v61_v15 }
  0x40   :  { %180 = shalt.err (!%p177_p7)
}
  0x41   :  { %s181_s13 = scalar_lea.hbm %s278_s2, 2048 }
  0x42   :  { %p182_p8 = scmp.ne.s32.totalorder %s278_s2, %s181_s13  ;;  %p185_p9 = scmp.lt.u32.totalorder %s181_s13, %s278_s2 }
  0x44   :  { %p187_p10 = pnand %p185_p9, %p182_p8 }
  0x46   :  { %190 = shalt.err (!%p187_p10)
}
  0x47   :  { %s216_s18 = smov 128   ;;  %s217_s19 = smov 8  }
  0x48   :  { %89 = dma.vmem_to_hbm [thread:$0]  %s84_s1, 2048, %s278_s2, [#allocation7], %s216_s18, %s216_s18, %s217_s19  }
  0x49   :  { %203 = dma.done.wait [#allocation7], 2048  }
  0x4a   :  { %204 = vsyncadd [#allocation7], 4294965248 }
  0x4b   :  { %93 = vsyncpa [#allocation7], 1 }
  0x4c   :  { %94 = vsyncmov [#allocation3] }
  0x4f   :  { %s95_s22 = vpop.sfrf %94 }
  0x50   :  { %p114_p11 = scmp.ne.s32.totalorder %s95_s22, 0 }
  0x52   :  { %99 = shalt.err (%p114_p11)  }

</bundles_post_ra>
